<compile_context>
chip_gen: v5e
topology: v5e:2x2
jax: 0.10.0
libtpu: 0.0.40
codegen_flags: <defaults>
</compile_context>

<pallas_src>
import jax
import jax.numpy as jnp
from jax.experimental import pallas as pl
from jax.experimental.pallas import tpu as pltpu


def conv_kernel(rel_ref, emb_ref, src_ref, idx_ref, dst_ref, out_ref, acc_ref, deg_ref):
    # rel:  [N_pad, TH]  node features (current feature tile)
    # emb:  [P_pad, TH]  pattern embedding table (current feature tile)
    # src:  [TE, 1]      int32 edge source node ids   (column layout)
    # idx:  [TE, 1]      int32 edge pattern ids       (column layout)
    # dst:  [1, TE]      int32 edge destination ids   (row layout; padded edges = N_pad -> no hit)
    # out:  [N_pad, TH]
    # acc:  [N_pad, TH]  f32 segment-sum accumulator (scratch)
    # deg:  [N_pad, 1]   f32 in-degree accumulator   (scratch)
    e = pl.program_id(1)
    n_e = pl.num_programs(1)

    @pl.when(e == 0)
    def _init():
        acc_ref[...] = jnp.zeros_like(acc_ref)
        deg_ref[...] = jnp.zeros_like(deg_ref)

    te = src_ref.shape[0]
    n_pad = rel_ref.shape[0]
    p_pad = emb_ref.shape[0]

    # Build one-hot gather/scatter operands in-kernel (VPU compares, no HBM bytes).
    src_oh = (src_ref[...] == jax.lax.broadcasted_iota(jnp.int32, (te, n_pad), 1)
              ).astype(jnp.float32)                                   # [TE, N_pad]
    idx_oh = (idx_ref[...] == jax.lax.broadcasted_iota(jnp.int32, (te, p_pad), 1)
              ).astype(jnp.float32)                                   # [TE, P_pad]
    # Transposed scatter one-hot built directly in node-major layout (no XLU transpose).
    dst_oh_t = (dst_ref[...] == jax.lax.broadcasted_iota(jnp.int32, (n_pad, te), 0)
                ).astype(jnp.float32)                                 # [N_pad, TE]

    # Gather source node features and pattern embeddings on the MXU.
    rel_src = jnp.dot(src_oh, rel_ref[...], preferred_element_type=jnp.float32)   # [TE, TH]
    pat = jnp.dot(idx_oh, emb_ref[...], preferred_element_type=jnp.float32)       # [TE, TH]

    # u_mul_e message.
    m = rel_src * pat                                                              # [TE, TH]

    # Segment-sum scatter over destination nodes (MXU) + in-degree (XLU row-sum).
    acc_ref[...] += jnp.dot(dst_oh_t, m, preferred_element_type=jnp.float32)       # [N_pad, TH]
    deg_ref[...] += jnp.sum(dst_oh_t, axis=1, keepdims=True)                       # [N_pad, 1]

    @pl.when(e == n_e - 1)
    def _finalize():
        deg = deg_ref[...]                                                         # [N_pad, 1]
        h_n = jnp.where(deg > 0.0, acc_ref[...] / jnp.maximum(deg, 1.0), 0.0)
        out_ref[...] = (h_n + rel_ref[...]).astype(out_ref.dtype)


def _round_up(x, m):
    return pl.cdiv(x, m) * m


def conv_forward(rel, emb_table, src, dst, edge_idx, *, max_edge_tile=512):
    """rel: [N, H] float32; emb_table: [P, H] float32; src/dst/edge_idx: [E] int32."""
    N, H = rel.shape
    E = src.shape[0]
    P = emb_table.shape[0]

    TH = 128                                   # lane-dense feature tile
    N_pad = _round_up(N, 8)
    P_pad = _round_up(P, 8)
    H_pad = _round_up(H, TH)

    # Edge tile: single tile if small, else a multiple of 128 (dst row layout needs it).
    E8 = _round_up(E, 8)
    TE = E8 if E8 <= max_edge_tile else max_edge_tile
    E_pad = _round_up(E, TE)

    # Pad features with zeros (padded rows/cols contribute nothing and are sliced off).
    rel_p = jnp.zeros((N_pad, H_pad), jnp.float32).at[:N, :H].set(rel.astype(jnp.float32))
    emb_p = jnp.zeros((P_pad, H_pad), jnp.float32).at[:P, :H].set(emb_table.astype(jnp.float32))

    # Index arrays: src/idx as [E_pad, 1] columns, dst as [1, E_pad] row.
    # Padded edges get dst = N_pad (out of range) -> all-zero scatter column -> no contribution.
    src_p = jnp.zeros((E_pad, 1), jnp.int32).at[:E, 0].set(src.astype(jnp.int32))
    idx_p = jnp.zeros((E_pad, 1), jnp.int32).at[:E, 0].set(edge_idx.astype(jnp.int32))
    dst_p = jnp.full((1, E_pad), N_pad, jnp.int32).at[0, :E].set(dst.astype(jnp.int32))

    n_h = H_pad // TH
    n_e = E_pad // TE

    flops = 2 * E_pad * H_pad * (2 * N_pad + P_pad) + E_pad * H_pad
    bytes_accessed = 4 * (2 * N_pad * H_pad + P_pad * H_pad + 3 * E_pad)

    out = pl.pallas_call(
        conv_kernel,
        out_shape=jax.ShapeDtypeStruct((N_pad, H_pad), jnp.float32),
        grid_spec=pltpu.PrefetchScalarGridSpec(
            num_scalar_prefetch=0,
            grid=(n_h, n_e),                       # (parallel feature tiles, reduction over edges)
            in_specs=[
                pl.BlockSpec((N_pad, TH), lambda h, e: (0, h)),   # rel (resident across e)
                pl.BlockSpec((P_pad, TH), lambda h, e: (0, h)),   # emb (resident across e)
                pl.BlockSpec((TE, 1), lambda h, e: (e, 0)),       # src ids
                pl.BlockSpec((TE, 1), lambda h, e: (e, 0)),       # pattern ids
                pl.BlockSpec((1, TE), lambda h, e: (0, e)),       # dst ids (row layout)
            ],
            out_specs=pl.BlockSpec((N_pad, TH), lambda h, e: (0, h)),
            scratch_shapes=[
                pltpu.VMEM((N_pad, TH), jnp.float32),             # segment-sum accumulator
                pltpu.VMEM((N_pad, 1), jnp.float32),              # in-degree accumulator
            ],
        ),
        compiler_params=pltpu.CompilerParams(
            dimension_semantics=("parallel", "arbitrary"),
            vmem_limit_bytes=48 * 1024 * 1024,                    # safe on v5e/v6e/v7x
        ),
        cost_estimate=pl.CostEstimate(
            flops=flops, transcendentals=0, bytes_accessed=bytes_accessed
        ),
    )(rel_p, emb_p, src_p, idx_p, dst_p)

    return out[:N, :H]


def reference_forward(rel, emb_table, src, dst, edge_idx):
    """Pure-JAX reference mimicking DGL u_mul_e + mean reduce."""
    N, H = rel.shape
    m = rel[src] * emb_table[edge_idx]                          # [E, H]
    s = jax.ops.segment_sum(m, dst, num_segments=N)             # [N, H]
    deg = jax.ops.segment_sum(jnp.ones_like(dst, jnp.float32), dst, num_segments=N)
    deg = deg[:, None]
    h_n = jnp.where(deg > 0, s / jnp.maximum(deg, 1.0), 0.0)
    return h_n + rel


if __name__ == "__main__":
    key = jax.random.PRNGKey(0)
    k_emb, k_rel, k_src, k_dst, k_idx = jax.random.split(key, 5)

    N = 8          # number of graph nodes
    E = 16         # number of edges
    H = 32         # hidden_size
    P = 10         # number of patterns (nn.Embedding(10, hidden_size))

    # Deterministic "parameters": embedding table ~ N(0, 1) like torch default.
    emb_table = jax.random.normal(k_emb, (P, H), dtype=jnp.float32)

    # Inputs: node features `rel` and a small random graph.
    rel = jax.random.normal(k_rel, (N, H), dtype=jnp.float32)
    src = jax.random.randint(k_src, (E,), 0, N, dtype=jnp.int32)
    dst = jax.random.randint(k_dst, (E,), 0, N, dtype=jnp.int32)
    edge_idx = jax.random.randint(k_idx, (E,), 0, P, dtype=jnp.int32)

    out = conv_forward(rel, emb_table, src, dst, edge_idx)
    out = jax.block_until_ready(out)

    ref = reference_forward(rel, emb_table, src, dst, edge_idx)
    assert out.shape == (N, H)
    assert jnp.allclose(out, ref, atol=1e-5, rtol=1e-5), "mismatch vs reference"

    print("KERNEL_OK")
</pallas_src>

<mosaic_0001>
module attributes {stable_mosaic.version = 11 : i64} {
  func.func @conv_kernel(%arg0: i32, %arg1: i32, %arg2: memref<8x128xf32, #tpu.memory_space<vmem>>, %arg3: memref<16x128xf32, #tpu.memory_space<vmem>>, %arg4: memref<16x1xi32, #tpu.memory_space<vmem>>, %arg5: memref<16x1xi32, #tpu.memory_space<vmem>>, %arg6: memref<1x16xi32, #tpu.memory_space<vmem>>, %arg7: memref<8x128xf32, #tpu.memory_space<vmem>>, %arg8: memref<8x128xf32, #tpu.memory_space<vmem>>, %arg9: memref<8x1xf32, #tpu.memory_space<vmem>>) attributes {dimension_semantics = [#tpu.dimension_semantics<parallel>, #tpu.dimension_semantics<arbitrary>], iteration_bounds = array<i64: 1, 1>, scalar_prefetch = 0 : i64, scratch_operands = 2 : i64, tpu.core_type = #tpu.core_type<tc>, window_params = [{transform_indices = @transform_0, window_bounds = array<i64: 8, 128>}, {transform_indices = @transform_1, window_bounds = array<i64: 16, 128>}, {transform_indices = @transform_2, window_bounds = array<i64: 16, 1>}, {transform_indices = @transform_3, window_bounds = array<i64: 16, 1>}, {transform_indices = @transform_4, window_bounds = array<i64: 1, 16>}, {transform_indices = @transform_5, window_bounds = array<i64: 8, 128>}]} {
    %c0_i32 = arith.constant 0 : i32
    %0 = arith.cmpi eq, %arg1, %c0_i32 : i32
    %1 = arith.extui %0 : i1 to i32
    %c0_i32_0 = arith.constant 0 : i32
    %2 = arith.cmpi ne, %1, %c0_i32_0 : i32
    scf.if %2 {
      %cst_23 = arith.constant 0.000000e+00 : f32
      %38 = vector.broadcast %cst_23 : f32 to vector<8x128xf32>
      %c0_24 = arith.constant 0 : index
      %c0_25 = arith.constant 0 : index
      %39 = vector.load %arg8[%c0_24, %c0_25] : memref<8x128xf32, #tpu.memory_space<vmem>>, vector<8x128xf32>
      tpu.vector_store %arg8[%c0_24, %c0_25], %38 {strides = array<i32>} : memref<8x128xf32, #tpu.memory_space<vmem>>, vector<8x128xf32>,
      %cst_26 = arith.constant 0.000000e+00 : f32
      %40 = vector.broadcast %cst_26 : f32 to vector<8x1xf32>
      %c0_27 = arith.constant 0 : index
      %c0_28 = arith.constant 0 : index
      %41 = vector.load %arg9[%c0_27, %c0_28] : memref<8x1xf32, #tpu.memory_space<vmem>>, vector<8x1xf32>
      tpu.vector_store %arg9[%c0_27, %c0_28], %40 {strides = array<i32>} : memref<8x1xf32, #tpu.memory_space<vmem>>, vector<8x1xf32>,
    } else {
    }
    %c0 = arith.constant 0 : index
    %c0_1 = arith.constant 0 : index
    %3 = vector.load %arg4[%c0, %c0_1] : memref<16x1xi32, #tpu.memory_space<vmem>>, vector<16x1xi32>
    %4 = tpu.iota {dimensions = array<i32: 1>} : vector<16x8xi32>
    %5 = vector.broadcast %3 : vector<16x1xi32> to vector<16x8xi32>
    %6 = arith.cmpi eq, %5, %4 : vector<16x8xi32>
    %7 = arith.extui %6 : vector<16x8xi1> to vector<16x8xi32>
    %8 = arith.sitofp %7 : vector<16x8xi32> to vector<16x8xf32>
    %c0_2 = arith.constant 0 : index
    %c0_3 = arith.constant 0 : index
    %9 = vector.load %arg5[%c0_2, %c0_3] : memref<16x1xi32, #tpu.memory_space<vmem>>, vector<16x1xi32>
    %10 = tpu.iota {dimensions = array<i32: 1>} : vector<16x16xi32>
    %11 = vector.broadcast %9 : vector<16x1xi32> to vector<16x16xi32>
    %12 = arith.cmpi eq, %11, %10 : vector<16x16xi32>
    %13 = arith.extui %12 : vector<16x16xi1> to vector<16x16xi32>
    %14 = arith.sitofp %13 : vector<16x16xi32> to vector<16x16xf32>
    %c0_4 = arith.constant 0 : index
    %c0_5 = arith.constant 0 : index
    %15 = vector.load %arg6[%c0_4, %c0_5] : memref<1x16xi32, #tpu.memory_space<vmem>>, vector<1x16xi32>
    %16 = tpu.iota {dimensions = array<i32: 0>} : vector<8x16xi32>
    %17 = vector.broadcast %15 : vector<1x16xi32> to vector<8x16xi32>
    %18 = arith.cmpi eq, %17, %16 : vector<8x16xi32>
    %19 = arith.extui %18 : vector<8x16xi1> to vector<8x16xi32>
    %20 = arith.sitofp %19 : vector<8x16xi32> to vector<8x16xf32>
    %c0_6 = arith.constant 0 : index
    %c0_7 = arith.constant 0 : index
    %21 = vector.load %arg2[%c0_6, %c0_7] : memref<8x128xf32, #tpu.memory_space<vmem>>, vector<8x128xf32>
    %cst = arith.constant dense<0.000000e+00> : vector<16x128xf32>
    %22 = tpu.matmul %8, %21, %cst {dimension_numbers = #tpu.dot_dimension_numbers<[1], [0], [0], [1], [0, 0, 1, 1], [], []>} : vector<16x8xf32>, vector<8x128xf32>, vector<16x128xf32> -> vector<16x128xf32>
    %c0_8 = arith.constant 0 : index
    %c0_9 = arith.constant 0 : index
    %23 = vector.load %arg3[%c0_8, %c0_9] : memref<16x128xf32, #tpu.memory_space<vmem>>, vector<16x128xf32>
    %cst_10 = arith.constant dense<0.000000e+00> : vector<16x128xf32>
    %24 = tpu.matmul %14, %23, %cst_10 {dimension_numbers = #tpu.dot_dimension_numbers<[1], [0], [0], [1], [0, 0, 1, 1], [], []>} : vector<16x16xf32>, vector<16x128xf32>, vector<16x128xf32> -> vector<16x128xf32>
    %25 = arith.mulf %22, %24 : vector<16x128xf32>
    %c0_11 = arith.constant 0 : index
    %c0_12 = arith.constant 0 : index
    %26 = vector.load %arg8[%c0_11, %c0_12] : memref<8x128xf32, #tpu.memory_space<vmem>>, vector<8x128xf32>
    %cst_13 = arith.constant dense<0.000000e+00> : vector<8x128xf32>
    %27 = tpu.matmul %20, %25, %cst_13 {dimension_numbers = #tpu.dot_dimension_numbers<[1], [0], [0], [1], [0, 0, 1, 1], [], []>} : vector<8x16xf32>, vector<16x128xf32>, vector<8x128xf32> -> vector<8x128xf32>
    %28 = arith.addf %26, %27 : vector<8x128xf32>
    %c0_14 = arith.constant 0 : index
    %c0_15 = arith.constant 0 : index
    %29 = vector.load %arg8[%c0_14, %c0_15] : memref<8x128xf32, #tpu.memory_space<vmem>>, vector<8x128xf32>
    tpu.vector_store %arg8[%c0_14, %c0_15], %28 {strides = array<i32>} : memref<8x128xf32, #tpu.memory_space<vmem>>, vector<8x128xf32>,
    %c0_16 = arith.constant 0 : index
    %c0_17 = arith.constant 0 : index
    %30 = vector.load %arg9[%c0_16, %c0_17] : memref<8x1xf32, #tpu.memory_space<vmem>>, vector<8x1xf32>
    %cst_18 = arith.constant dense<0.000000e+00> : vector<8xf32>
    %31 = vector.multi_reduction <add>, %20, %cst_18 [1] : vector<8x16xf32> to vector<8xf32>
    %32 = vector.shape_cast %31 : vector<8xf32> to vector<8x1xf32>
    %33 = arith.addf %30, %32 : vector<8x1xf32>
    %c0_19 = arith.constant 0 : index
    %c0_20 = arith.constant 0 : index
    %34 = vector.load %arg9[%c0_19, %c0_20] : memref<8x1xf32, #tpu.memory_space<vmem>>, vector<8x1xf32>
    tpu.vector_store %arg9[%c0_19, %c0_20], %33 {strides = array<i32>} : memref<8x1xf32, #tpu.memory_space<vmem>>, vector<8x1xf32>,
    %c0_i32_21 = arith.constant 0 : i32
    %35 = arith.cmpi eq, %arg1, %c0_i32_21 : i32
    %36 = arith.extui %35 : i1 to i32
    %c0_i32_22 = arith.constant 0 : i32
    %37 = arith.cmpi ne, %36, %c0_i32_22 : i32
    scf.if %37 {
      %c0_23 = arith.constant 0 : index
      %c0_24 = arith.constant 0 : index
      %38 = vector.load %arg9[%c0_23, %c0_24] : memref<8x1xf32, #tpu.memory_space<vmem>>, vector<8x1xf32>
      %cst_25 = arith.constant 0.000000e+00 : f32
      %39 = vector.broadcast %cst_25 : f32 to vector<8x1xf32>
      %40 = arith.cmpf ogt, %38, %39 : vector<8x1xf32>
      %c0_26 = arith.constant 0 : index
      %c0_27 = arith.constant 0 : index
      %41 = vector.load %arg8[%c0_26, %c0_27] : memref<8x128xf32, #tpu.memory_space<vmem>>, vector<8x128xf32>
      %cst_28 = arith.constant 1.000000e+00 : f32
      %42 = vector.broadcast %cst_28 : f32 to vector<8x1xf32>
      %43 = arith.maximumf %38, %42 : vector<8x1xf32>
      %44 = vector.broadcast %43 : vector<8x1xf32> to vector<8x128xf32>
      %45 = arith.divf %41, %44 : vector<8x128xf32>
      %cst_29 = arith.constant 0.000000e+00 : f32
      %46 = vector.shape_cast %40 : vector<8x1xi1> to vector<8x1xi1>
      %47 = vector.broadcast %46 : vector<8x1xi1> to vector<8x128xi1>
      %48 = vector.broadcast %cst_29 : f32 to vector<8x128xf32>
      %49 = arith.select %47, %45, %48 : vector<8x128xi1>, vector<8x128xf32>
      %c0_30 = arith.constant 0 : index
      %c0_31 = arith.constant 0 : index
      %50 = vector.load %arg2[%c0_30, %c0_31] : memref<8x128xf32, #tpu.memory_space<vmem>>, vector<8x128xf32>
      %51 = arith.addf %49, %50 : vector<8x128xf32>
      %c0_32 = arith.constant 0 : index
      %c0_33 = arith.constant 0 : index
      %52 = vector.load %arg7[%c0_32, %c0_33] : memref<8x128xf32, #tpu.memory_space<vmem>>, vector<8x128xf32>
      tpu.vector_store %arg7[%c0_32, %c0_33], %51 {strides = array<i32>} : memref<8x128xf32, #tpu.memory_space<vmem>>, vector<8x128xf32>,
    } else {
    }
    return
  }
  func.func @transform_0(%arg0: i32, %arg1: i32) -> (i32, i32) {
    %c0_i32 = arith.constant 0 : i32
    %c0_i32_0 = arith.constant 0 : i32
    return %c0_i32, %arg0 : i32, i32
  }
  func.func @transform_1(%arg0: i32, %arg1: i32) -> (i32, i32) {
    %c0_i32 = arith.constant 0 : i32
    %c0_i32_0 = arith.constant 0 : i32
    return %c0_i32, %arg0 : i32, i32
  }
  func.func @transform_2(%arg0: i32, %arg1: i32) -> (i32, i32) {
    %c0_i32 = arith.constant 0 : i32
    %c0_i32_0 = arith.constant 0 : i32
    return %arg1, %c0_i32 : i32, i32
  }
  func.func @transform_3(%arg0: i32, %arg1: i32) -> (i32, i32) {
    %c0_i32 = arith.constant 0 : i32
    %c0_i32_0 = arith.constant 0 : i32
    return %arg1, %c0_i32 : i32, i32
  }
  func.func @transform_4(%arg0: i32, %arg1: i32) -> (i32, i32) {
    %c0_i32 = arith.constant 0 : i32
    %c0_i32_0 = arith.constant 0 : i32
    return %c0_i32, %arg1 : i32, i32
  }
  func.func @transform_5(%arg0: i32, %arg1: i32) -> (i32, i32) {
    %c0_i32 = arith.constant 0 : i32
    %c0_i32_0 = arith.constant 0 : i32
    return %c0_i32, %arg0 : i32, i32
  }
}

</mosaic_0001>

<bundles_post_ra>
// kernel: tpu_custom_call.1
= control target key start
LH: loop header
LB: loop body
LE: loop exit
PB: predicated region body
PF: predicated region fallthrough
CT: control target
= control target key end

     0   :  { %v30_v2 = vlaneseq  ;;  %v262_v3 = vmov 0   ;;  %s334_s0 = inlined_call_operand.vmem [shape: f32[8,128], index: 0, kind: input, shape index: {}]   ;;  %s335_s1 = inlined_call_operand.vmem [shape: f32[16,128], index: 1, kind: input, shape index: {}]   ;;  %s336_s2 = inlined_call_operand.vmem [shape: s32[16,1], index: 2, kind: input, shape index: {}]   ;;  %s337_s3 = inlined_call_operand.vmem [shape: s32[16,1], index: 3, kind: input, shape index: {}]   ;;  %s338_s4 = inlined_call_operand.vmem [shape: s32[1,16], index: 4, kind: input, shape index: {}]   ;;  %s339_s5 = inlined_call_operand.hbm [shape: f32[8,128], index: 5, kind: output, shape index: {}]  }
   0x1   :  { %v29_v0 = vld [vmem:[%s336_s2 + $0x8] sm:$0xff]  ;;  %v28_v1 = vld [vmem:[%s336_s2] sm:$0xff]  ;;  %231 = vset.pattern.permute.xlu1 %v262_v3  ;;  %230 = vset.pattern.permute.xlu0 %v262_v3 }
   0x2   :  { %v233_v4 = vld [vmem:[%s338_s4] ss:$0 sm:$0xff]  ;;  %36 = vperm.xlu1 %231, %v29_v0   ;;  %33 = vperm.xlu0 %230, %v28_v1   ;;  %v60_v5 = vshrl.u32 %v30_v2, 7 }
   0x3   :  { %10 = vsyncpa [#allocation5], 0  ;;  %vm98_vm0 = vcmask 130048   ;;  %232 = vset.pattern.permute.xlu2 %v262_v3  ;;  %v263_v6 = vmov 0.0   ;;  %v44_v9 = vld [vmem:[%s337_s3] sm:$0xff]  ;;  %v45_v10 = vld [vmem:[%s337_s3 + $0x8] sm:$0xff] }
   0x4   :  { %vm62_vm1 = vcmp.eq.s32.totalorder %v233_v4, %v60_v5  ;;  %vm26_vm2 = vcmask 7168   ;;  %v315_v11 = vld [vmem:[%s334_s0] sm:$0xff]  ;;  %v97_v12 = vld [vmem:[%s335_s1 + $0x8] sm:$0xff]  ;;  %v31_v14 = vand.u32 127, %v30_v2  ;;  %vm66_vm3 = vcmask 64512   ;;  %s264_s0 = smov [#allocation4]  }
   0x5   :  { %v219_v7 = vsel %vm62_vm1, 1.0, %v263_v6  ;;  %27 = vst.msk [vmem:[#allocation3] sm:$0xff] %vm26_vm2, %v263_v6  ;;  %88 = vmatpush.msra.mxu0 %v315_v11  ;;  %119 = vmatpush.msra.mxu1 %v97_v12  ;;  %v96_v13 = vld [vmem:[%s335_s1] sm:$0xff]  ;;  %s204_s1 = sshll.u32 %s264_s0, 4  ;;  %s206_s8 = sshll.u32 %s339_s5, 4  ;;  %s205_s1 = int_to_ptr.vmem [resolvable:$true] %s204_s1  ;;  %s207_s8 = int_to_ptr.hbm [resolvable:$true] %s206_s8 }
   0x6   :  { %v157_v8 = vsel %vm98_vm0, %v219_v7, 0.0  ;;  %225 = vmatpush.msra.mxu3 %v97_v12 }
   0x7   :  { %158 = vadd.xlane.f32.xlu2 %v157_v8  ;;  %120 = vmatpush.msra.mxu1 %v96_v13 }
   0x8   :  { %226 = vmatpush.msra.mxu3 %v96_v13 }
   0xa   :  { %47 = vperm.xlu1 %231, %v44_v9   ;;  %50 = vperm.xlu0 %230, %v45_v10  }
   0xc   :  { %v156_v18 = vld [vmem:[#allocation3] sm:$0xff] }
  0x74   :  { %v37_v15 = vpop.permute.xlu1 %36  ;;  %v34_v16 = vpop.permute.xlu0 %33 }
  0x75   :  { %vm38_vm4 = vcmp.eq.s32.totalorder %v34_v16, %v31_v14  ;;  %vm39_vm5 = vcmp.eq.s32.totalorder %v37_v15, %v31_v14 }
  0x76   :  { %v215_v17 = vsel %vm38_vm4, 1.0, %v263_v6  ;;  %v216_v21 = vsel %vm39_vm5, 1.0, %v263_v6 }
  0x77   :  { %220 = vmatmul.msk.f32.vlgmr.msra.gmra.mxu0 %vm66_vm3, %v215_v17 }
  0x7a   :  { %v159_v19 = vpop.xlane.xlu2 %158 }
  0x7b   :  { %v160_v20 = vadd.f32 %v159_v19, %v156_v18 }
  0x7c   :  { %v48_v22 = vpop.permute.xlu1 %47  ;;  %v51_v23 = vpop.permute.xlu0 %50 }
  0x7d   :  { %162 = vst.msk [vmem:[#allocation3] sm:$0xff] %vm26_vm2, %v160_v20  ;;  %vm52_vm6 = vcmp.eq.s32.totalorder %v48_v22, %v31_v14  ;;  %vm53_vm7 = vcmp.eq.s32.totalorder %v51_v23, %v31_v14 }
  0x7e   :  { %v217_v24 = vsel %vm52_vm6, 1.0, %v263_v6  ;;  %v218_v25 = vsel %vm53_vm7, 1.0, %v263_v6 }
  0x7f   :  { %221 = vmatmul.msk.f32.gmra.mxu0 %vm66_vm3, %v216_v21  ;;  %222 = vmatmul.msk.f32.vlgmr.msra.gmra.mxu1 %vm98_vm0, %v217_v24 }
  0x80   :  { %223 = vmatmul.msk.f32.vlgmr.msra.gmra.mxu3 %vm98_vm0, %v218_v25 }
  0x84   :  { %v166_v26 = vld [vmem:[#allocation3] sm:$0xff] }
  0x85   :  { %vm167_vm8 = vcmp.gt.f32.partialorder %v166_v26, 0.0  ;;  %v169_v28 = vmax.f32 %v166_v26, 1.0 }
  0x86   :  { %v190_v27 = vsel %vm167_vm8, 1, %v262_v3 }
  0x87   :  { %192 = vperm.xlu0 %230, %v190_v27   ;;  %172 = vperm.xlu2 %232, %v169_v28  }
  0xe1   :  { %v173_v35 = vpop.permute.xlu2 %172 }
  0xe2   :  { %234 = vrcp.f32 %v173_v35  ;;  %vm180_vm9 = vweird.f32 %v173_v35  ;;  %v186_v40 = vand.u32 2147483648, %v173_v35  ;;  %v184_v42 = vand.u32 2147483647, %v173_v35 }
  0xe4   :  { %v187_v43 = vor.u32 1.1754944e-38, %v186_v40  ;;  %vm185_vm12 = vcmp.eq.f32.partialorder %v184_v42, 8.507059e+37 }
  0xe8   :  { %v235_v36 = vpop.eup %234 }
  0xe9   :  { %v176_v37 = vmul.f32 %v235_v36, %v173_v35  ;;  %vm181_vm10 = vweird.f32 %v235_v36 }
  0xea   :  { %vm182_vm11 = vmor %vm180_vm9, %vm181_vm10 }
  0xeb   :  { %v177_v38 = vsub.f32 1.0, %v176_v37 }
  0xed   :  { %v178_v39 = vmul.f32 %v235_v36, %v177_v38 }
  0xef   :  { %v179_v41 = vadd.f32 %v235_v36, %v178_v39 }
  0xf1   :  { %v183_v44 = vsel %vm182_vm11, %v235_v36, %v179_v41 }
  0xf2   :  { %v188_v47 = vsel %vm185_vm12, %v187_v43, %v183_v44 }
  0xf4   :  { %v90_v29 = vpop.f32.mrf.mxu0 }
  0xf9   :  { %v193_v45 = vpop.permute.xlu0 %192 }
  0xfa   :  { %vm194_vm13 = vcmp.eq.s32.totalorder %v193_v45, 1 }
  0xfc   :  { %v93_v30 = vpop.f32.mrf.mxu0  ;;  %v122_v31 = vpop.f32.mrf.mxu1 }
  0xfd   :  { %v128_v34 = vmul.f32 %v122_v31, %v90_v29 }
 0x103   :  { %v125_v32 = vpop.f32.mrf.mxu3 }
 0x104   :  { %v129_v33 = vmul.f32 %v125_v32, %v93_v30 }
 0x106   :  { %148 = vmatpush.msra.mxu2 %v129_v33 }
 0x108   :  { %149 = vmatpush.msra.mxu2 %v128_v34 }
 0x109   :  { %224 = vmatmul.msk.f32.vlgmr.msra.gmra.mxu2 %vm98_vm0, %v219_v7 }
 0x18c   :  { %v151_v46 = vpop.f32.mrf.mxu2 }
 0x18d   :  { %v189_v48 = vmul.f32 %v188_v47, %v151_v46 }
 0x18f   :  { %v195_v49 = vsel %vm194_vm13, %v189_v48, 0.0 }
 0x190   :  { %v197_v50 = vadd.f32 %v195_v49, %v315_v11 }
 0x192   :  { %198 = vst [vmem:[#allocation4] sm:$0xff] %v197_v50 }
 0x193   :  { %209 = dma.vmem_to_hbm [thread:$0]  %s205_s1, 128, %s207_s8, [#allocation5]  }
 0x194   :  { %260 = dma.done.wait [#allocation5], 128  }
 0x195   :  { %261 = vsyncadd [#allocation5], 4294967168 }
 0x196   :  { %214 = vsyncpa [#allocation5], 1 }

</bundles_post_ra>
